<compile_context>
chip_gen: v6e
topology: v6e:2x2x1
jax: 0.10.0
libtpu: 0.0.40
codegen_flags: <defaults>
</compile_context>

<pallas_src>
import functools

import numpy as np
import jax
import jax.numpy as jnp
from jax.experimental import pallas as pl
from jax.experimental.pallas import tpu as pltpu


def _unpool_kernel(g_ref, x_ref, o_ref):
    # One MXU matmul against the constant one-hot scatter matrix:
    #   o[r, q] = sum_p x[r, p] * G[p, q]
    # G has exact 0/1 entries, so the result equals x exactly.
    # TODO(synk): if a bundle dump shows the f32 multi-pass MXU path binding on
    # v7x/v5e, switch to a corner-band matmul (s*s fewer MACs) or VPU dilation.
    o_ref[...] = jnp.dot(
        x_ref[...], g_ref[...], preferred_element_type=jnp.float32
    ).astype(o_ref.dtype)


def _mxu_lane_target():
    """MXU depth to aim the folded lane width (K) at: 256 on v6e/v7x, else 128."""
    try:
        kind = jax.devices()[0].device_kind.lower()
    except Exception:
        return 128
    if "v6" in kind or "v7" in kind:
        return 256
    return 128


def _step_byte_budget():
    """Target bytes of (input + output) streamed per grid step, scaled to the
    chip's VMEM capacity (double-buffering keeps 2x this resident)."""
    try:
        vmem = pltpu.get_tpu_info().vmem_capacity_bytes
    except Exception:
        vmem = 64 << 20  # v7x per-TC size: the conservative case
    return max(4 << 20, min(16 << 20, vmem // 5))


def _pick_row_group(total_rows, W, s, itemsize, lane_target, min_rows):
    """Pick g | total_rows so g*W >= 128 (lane-dense) and as close to the MXU
    depth as possible, while keeping the resident scatter matrix G small and
    leaving at least `min_rows` folded rows (so the grid can have >=2 steps)."""
    g = 1
    for d in range(1, total_rows + 1):
        if total_rows % d:
            continue
        gW = d * W
        if g * W >= 128:
            # Already lane-dense; only grow toward the MXU depth if it stays
            # within target, keeps G modest, and leaves enough rows.
            if (gW > lane_target
                    or gW * gW * s * s * itemsize > (4 << 20)
                    or total_rows // d < min_rows):
                break
        g = d
        if gW >= lane_target:
            break
    return g


@functools.partial(jax.jit, static_argnames=("stride",))
def unpool(x, stride=2):
    """Pallas equivalent of Unpool.forward (NCHW in / NCHW out).

    The module's depthwise conv_transpose2d weights are the fixed
    'top-left corner = 1, rest 0' pattern set in __init__, so the op is
    specialized statically to corner scattering (zero numerical change).
    """
    s = int(stride)
    N, C, H, W = x.shape

    if s == 1:
        # Identity kernel with stride 1: conv_transpose2d just copies x.
        return x

    Hs, Ws = H * s, W * s
    itemsize = jnp.dtype(x.dtype).itemsize
    sub = {4: 8, 2: 16, 1: 32}.get(itemsize, 8)  # sublane packing multiple

    # Fold g consecutive flat (N*C*H) rows into the lane dimension (free).
    total_rows = N * C * H
    g = _pick_row_group(total_rows, W, s, itemsize, _mxu_lane_target(), 2 * sub)
    L_in = g * W                 # input lane width  (matmul K)
    L_out = g * s * s * W        # output lane width (covers g*s output rows)
    M_rows = total_rows // g

    x2 = x.reshape(M_rows, L_in)

    # Constant one-hot scatter matrix: input lane p = di*W + j lands at output
    # lane q = di*s*s*W + j*s  (the (0,0) corner of each sxs block).
    p = np.arange(L_in)
    q = (p // W) * (s * s * W) + (p % W) * s
    G = jnp.asarray(q[:, None] == np.arange(L_out)[None, :], dtype=x.dtype)

    # Row block per grid step: generation-aware byte budget, sublane-rounded,
    # capped so the grid has >= 2 steps when possible (v7x megacore sharding).
    row_bytes = (L_in + L_out) * itemsize
    if M_rows <= sub:
        rb = M_rows                               # single full-extent block
    else:
        rb = max(sub, min(_step_byte_budget() // row_bytes, M_rows) // sub * sub)
        if M_rows >= 2 * sub:
            half = -(-((M_rows + 1) // 2) // sub) * sub
            rb = min(rb, half)
    grid = (pl.cdiv(M_rows, rb),)

    # VMEM limit from actual footprint: double-buffered in/out blocks, the
    # (single-buffered) resident G counted twice for margin, plus slack.
    g_bytes = L_in * L_out * itemsize
    io_bytes = 2 * rb * (L_in + L_out) * itemsize
    vmem_limit = int(min(60 << 20, max(8 << 20, io_bytes + 2 * g_bytes + (4 << 20))))

    out2 = pl.pallas_call(
        _unpool_kernel,
        out_shape=jax.ShapeDtypeStruct((M_rows, L_out), x.dtype),
        grid=grid,
        in_specs=[
            # scatter matrix: constant block index + single buffer -> fetched
            # once, one resident VMEM copy
            pl.BlockSpec((L_in, L_out), lambda r: (0, 0),
                         pipeline_mode=pl.Buffered(1)),
            pl.BlockSpec((rb, L_in), lambda r: (r, 0)),
        ],
        out_specs=pl.BlockSpec((rb, L_out), lambda r: (r, 0)),
        compiler_params=pltpu.CompilerParams(
            dimension_semantics=("parallel",),
            vmem_limit_bytes=vmem_limit,
        ),
    )(G, x2)

    # Free row-major reshape back to NCHW.
    return out2.reshape(N, C, Hs, Ws)


def _reference(x, stride):
    """Pure-JAX reference: depthwise conv_transpose2d with the module's fixed
    weights (zeros except weights[:, :, 0, 0] = 1), kernel size == stride."""
    N, C, H, W = x.shape
    w = jnp.zeros((C, stride, stride), x.dtype).at[:, 0, 0].set(1)
    return jnp.einsum("nchw,cab->nchawb", x, w).reshape(
        N, C, H * stride, W * stride)


if __name__ == "__main__":
    key = jax.random.PRNGKey(0)

    # Main case (module defaults): N=2, C=4, H=W=16, stride=2.
    N, C, H, W, stride = 2, 4, 16, 16, 2
    x = jax.random.normal(key, (N, C, H, W), dtype=jnp.float32)
    out = jax.block_until_ready(unpool(x, stride=stride))
    ref = _reference(x, stride)
    assert out.shape == (N, C, H * stride, W * stride)
    assert out.dtype == x.dtype
    assert jnp.allclose(out, ref, atol=1e-6), float(jnp.max(jnp.abs(out - ref)))

    # Awkward shape: exercises the generalized (N*C*H) row folding and
    # full-extent (non-multiple-of-8) row blocks.
    x2 = jax.random.normal(jax.random.PRNGKey(1), (1, 3, 10, 12), jnp.float32)
    out2 = jax.block_until_ready(unpool(x2, stride=2))
    ref2 = _reference(x2, 2)
    assert out2.shape == (1, 3, 20, 24)
    assert jnp.allclose(out2, ref2, atol=1e-6), float(jnp.max(jnp.abs(out2 - ref2)))

    print("KERNEL_OK")
</pallas_src>

<mosaic_0001>
module attributes {stable_mosaic.version = 11 : i64} {
  func.func @_unpool_kernel(%arg0: i32, %arg1: memref<128x512xf32, #tpu.memory_space<vmem>>, %arg2: memref<8x128xf32, #tpu.memory_space<vmem>>, %arg3: memref<8x512xf32, #tpu.memory_space<vmem>>) attributes {dimension_semantics = [#tpu.dimension_semantics<parallel>], iteration_bounds = array<i64: 2>, scalar_prefetch = 0 : i64, scratch_operands = 0 : i64, tpu.core_type = #tpu.core_type<tc>, window_params = [{pipeline_mode = #tpu.pipeline_mode<synchronous>, transform_indices = @transform_0, window_bounds = array<i64: 128, 512>}, {transform_indices = @transform_1, window_bounds = array<i64: 8, 128>}, {transform_indices = @transform_2, window_bounds = array<i64: 8, 512>}]} {
    %c0 = arith.constant 0 : index
    %c0_0 = arith.constant 0 : index
    %0 = vector.load %arg2[%c0, %c0_0] : memref<8x128xf32, #tpu.memory_space<vmem>>, vector<8x128xf32>
    %c0_1 = arith.constant 0 : index
    %c0_2 = arith.constant 0 : index
    %1 = vector.load %arg1[%c0_1, %c0_2] : memref<128x512xf32, #tpu.memory_space<vmem>>, vector<128x512xf32>
    %cst = arith.constant dense<0.000000e+00> : vector<8x512xf32>
    %2 = tpu.matmul %0, %1, %cst {dimension_numbers = #tpu.dot_dimension_numbers<[1], [0], [0], [1], [0, 0, 1, 1], [], []>} : vector<8x128xf32>, vector<128x512xf32>, vector<8x512xf32> -> vector<8x512xf32>
    %c0_3 = arith.constant 0 : index
    %c0_4 = arith.constant 0 : index
    %3 = vector.load %arg3[%c0_3, %c0_4] : memref<8x512xf32, #tpu.memory_space<vmem>>, vector<8x512xf32>
    tpu.vector_store %arg3[%c0_3, %c0_4], %2 {strides = array<i32>} : memref<8x512xf32, #tpu.memory_space<vmem>>, vector<8x512xf32>,
    return
  }
  func.func @transform_0(%arg0: i32) -> (i32, i32) {
    %c0_i32 = arith.constant 0 : i32
    %c0_i32_0 = arith.constant 0 : i32
    %c0_i32_1 = arith.constant 0 : i32
    return %c0_i32, %c0_i32_0 : i32, i32
  }
  func.func @transform_1(%arg0: i32) -> (i32, i32) {
    %c0_i32 = arith.constant 0 : i32
    %c0_i32_0 = arith.constant 0 : i32
    return %arg0, %c0_i32 : i32, i32
  }
  func.func @transform_2(%arg0: i32) -> (i32, i32) {
    %c0_i32 = arith.constant 0 : i32
    %c0_i32_0 = arith.constant 0 : i32
    return %arg0, %c0_i32 : i32, i32
  }
}

</mosaic_0001>

<bundles_post_ra>
// kernel: unpool.1
= control target key start
LH: loop header
LB: loop body
LE: loop exit
PB: predicated region body
PF: predicated region fallthrough
CT: control target
= control target key end

     0   :  { %7 = vsyncpa [#allocation3], 0  ;;  %s526_s9 = smov 0   ;;  %s571_s0 = inlined_call_operand.hbm [shape: f32[128,512], index: 0, kind: input, shape index: {}]   ;;  %s572_s1 = inlined_call_operand.vmem [shape: f32[16,128], index: 1, kind: input, shape index: {}]   ;;  %s573_s2 = inlined_call_operand.vmem [shape: f32[16,512], index: 2, kind: output, shape index: {}]  }
   0x1 LB: > { %s532_s10 = sadd.s32 4294967295, %s505_s9   ;;  %p436_p0 = scmp.ge.s32.totalorder %s505_s9, 1  ;;  %s505_s9 = sphi %s526_s9, %s13_s9  }
   0x2   : > { %p91_p1 = scmp.lt.s32.totalorder %s505_s9, 3  ;;  %s507_s11 = smov [#allocation2]  }
   0x3   : > { %s103_s12 = sshll.u32 %s507_s11, 4  ;;  %p455_p3 = scmp.eq.s32.totalorder %s532_s10, 0  ;;  %s104_s12 = int_to_ptr.vmem [resolvable:$true] %s103_s12 }
   0x4   : > { %p536_p2 = pnand %p436_p0, %p91_p1  ;;  %s480_s14 = scalar_lea.vmem %s104_s12, 8192 }
   0x5   : > { %p481_p7 = scmp.ne.s32.totalorder %s104_s12, %s480_s14  ;;  %p488_p10 = scmp.lt.s32.totalorder %s104_s12, %s104_s12 }
   0x6   : > { %p451_p4 = pneg %p536_p2  ;;  %p489_p11 = scmp.lt.s32.totalorder %s480_s14, %s480_s14 }
   0x8   : > { %p452_p5 = pnand %p455_p3, %p451_p4  ;;  %p490_p12 = por %p489_p11, %p488_p10 }
   0xa   : > { %p471_p6 = pneg %p452_p5 }
   0xc   : > { %p483_p8 = pnand %p481_p7, %p471_p6 }
   0xe   : > { %p484_p9 = pneg %p483_p8 }
  0x10   : > { %p491_p13 = pnand %p490_p12, %p484_p9 }
  0x12   : > { %494 = shalt.err (!%p491_p13)
}
  0x13   : > { %s508_s15 = smov 512   ;;  %s509_s16 = smov 32  }
  0x14   : > { %454 = dma.hbm_to_vmem [thread:$0]  (!%p452_p5), %s571_s0, 8192, %s104_s12, [#allocation3], %s508_s15, %s508_s15, %s509_s16  }
  0x15   : > { %126 = sbr.rel (%p536_p2) target bundleno = 257 (0x101), region = 28 }
  0x1a   : > { %500 = dma.done.wait (%p455_p3), [#allocation3], 8192  }
  0x1b   : > { %502 = vsyncadd (%p455_p3), [#allocation3], 4294959104  ;;  %v510_v0 = vmov 0.0   ;;  %v218_v1 = vld [vmem:[#allocation2 + $0x1e8] sm:$0xff]  ;;  %v220_v2 = vld [vmem:[#allocation2 + $0x1f8] sm:$0xff]  ;;  %p147_p0 = scmp.lt.s32.totalorder %s532_s10, 1 }
  0x1c   : > { %285 = vmatprep.mubr.f32.mxu0 %v510_v0  ;;  %356 = vmatprep.mubr.f32.mxu1 %v510_v0  ;;  %v217_v3 = vld [vmem:[#allocation2 + $0x1e0] sm:$0xff]  ;;  %v219_v4 = vld [vmem:[#allocation2 + $0x1f0] sm:$0xff]  ;;  %v214_v5 = vld [vmem:[#allocation2 + $0x1c8] sm:$0xff] }
  0x1d   : > { %221 = vmatprep.subr.mxu0 %v218_v1  ;;  %292 = vmatprep.subr.mxu1 %v220_v2  ;;  %v216_v6 = vld [vmem:[#allocation2 + $0x1d8] sm:$0xff]  ;;  %v213_v7 = vld [vmem:[#allocation2 + $0x1c0] sm:$0xff]  ;;  %v215_v8 = vld [vmem:[#allocation2 + $0x1d0] sm:$0xff]  ;;  %s576_s10 = smov (!%p147_p0, %s532_s10), 1 }
  0x1e   : > { %222 = vmatpush1.msra.mxu0 %v217_v3  ;;  %293 = vmatpush1.msra.mxu1 %v219_v4  ;;  %v210_v9 = vld [vmem:[#allocation2 + $0x1a8] sm:$0xff]  ;;  %v212_v10 = vld [vmem:[#allocation2 + $0x1b8] sm:$0xff]  ;;  %v209_v11 = vld [vmem:[#allocation2 + $0x1a0] sm:$0xff]  ;;  %s441_s19 = sshll.u32 %s576_s10, 3  ;;  %s446_s23 = sshll.u32 %s576_s10, 5 }
  0x1f   : > { %223 = vmatprep.subr.mxu0 %v214_v5  ;;  %294 = vmatprep.subr.mxu1 %v216_v6  ;;  %v211_v12 = vld [vmem:[#allocation2 + $0x1b0] sm:$0xff]  ;;  %v206_v13 = vld [vmem:[#allocation2 + $0x188] sm:$0xff]  ;;  %v208_v14 = vld [vmem:[#allocation2 + $0x198] sm:$0xff]  ;;  %s150_s22 = scalar_lea.vmem %s572_s1, %s441_s19  ;;  %s155_s26 = scalar_lea.vmem %s573_s2, %s446_s23 }
  0x20   : > { %224 = vmatpush1.msra.mxu0 %v213_v7  ;;  %295 = vmatpush1.msra.mxu1 %v215_v8  ;;  %v205_v15 = vld [vmem:[#allocation2 + $0x180] sm:$0xff]  ;;  %v207_v16 = vld [vmem:[#allocation2 + $0x190] sm:$0xff]  ;;  %v202_v17 = vld [vmem:[#allocation2 + $0x168] sm:$0xff] }
  0x21   : > { %225 = vmatprep.subr.mxu0 %v210_v9  ;;  %296 = vmatprep.subr.mxu1 %v212_v10  ;;  %v204_v18 = vld [vmem:[#allocation2 + $0x178] sm:$0xff]  ;;  %v201_v19 = vld [vmem:[#allocation2 + $0x160] sm:$0xff]  ;;  %v203_v20 = vld [vmem:[#allocation2 + $0x170] sm:$0xff] }
  0x22   : > { %226 = vmatpush1.msra.mxu0 %v209_v11  ;;  %297 = vmatpush1.msra.mxu1 %v211_v12  ;;  %v198_v21 = vld [vmem:[#allocation2 + $0x148] sm:$0xff]  ;;  %v200_v22 = vld [vmem:[#allocation2 + $0x158] sm:$0xff]  ;;  %v197_v23 = vld [vmem:[#allocation2 + $0x140] sm:$0xff] }
  0x23   : > { %227 = vmatprep.subr.mxu0 %v206_v13  ;;  %298 = vmatprep.subr.mxu1 %v208_v14  ;;  %v199_v24 = vld [vmem:[#allocation2 + $0x150] sm:$0xff]  ;;  %v194_v25 = vld [vmem:[#allocation2 + $0x128] sm:$0xff]  ;;  %v196_v26 = vld [vmem:[#allocation2 + $0x138] sm:$0xff] }
  0x24   : > { %228 = vmatpush1.msra.mxu0 %v205_v15  ;;  %299 = vmatpush1.msra.mxu1 %v207_v16  ;;  %v193_v27 = vld [vmem:[#allocation2 + $0x120] sm:$0xff]  ;;  %v195_v28 = vld [vmem:[#allocation2 + $0x130] sm:$0xff]  ;;  %v190_v29 = vld [vmem:[#allocation2 + $0x108] sm:$0xff] }
  0x25   : > { %229 = vmatprep.subr.mxu0 %v202_v17  ;;  %300 = vmatprep.subr.mxu1 %v204_v18  ;;  %v192_v30 = vld [vmem:[#allocation2 + $0x118] sm:$0xff]  ;;  %v189_v31 = vld [vmem:[#allocation2 + $0x100] sm:$0xff]  ;;  %v191_v32 = vld [vmem:[#allocation2 + $0x110] sm:$0xff] }
  0x26   : > { %230 = vmatpush1.msra.mxu0 %v201_v19  ;;  %301 = vmatpush1.msra.mxu1 %v203_v20  ;;  %v186_v33 = vld [vmem:[#allocation2 + $0xe8] sm:$0xff]  ;;  %v188_v34 = vld [vmem:[#allocation2 + $0xf8] sm:$0xff]  ;;  %v185_v35 = vld [vmem:[#allocation2 + $0xe0] sm:$0xff] }
  0x27   : > { %231 = vmatprep.subr.mxu0 %v198_v21  ;;  %302 = vmatprep.subr.mxu1 %v200_v22  ;;  %v187_v36 = vld [vmem:[#allocation2 + $0xf0] sm:$0xff]  ;;  %v182_v37 = vld [vmem:[#allocation2 + $0xc8] sm:$0xff]  ;;  %v184_v38 = vld [vmem:[#allocation2 + $0xd8] sm:$0xff] }
  0x28   : > { %232 = vmatpush1.msra.mxu0 %v197_v23  ;;  %303 = vmatpush1.msra.mxu1 %v199_v24  ;;  %v181_v39 = vld [vmem:[#allocation2 + $0xc0] sm:$0xff]  ;;  %v183_v40 = vld [vmem:[#allocation2 + $0xd0] sm:$0xff]  ;;  %v178_v41 = vld [vmem:[#allocation2 + $0xa8] sm:$0xff] }
  0x29   : > { %233 = vmatprep.subr.mxu0 %v194_v25  ;;  %304 = vmatprep.subr.mxu1 %v196_v26  ;;  %v180_v42 = vld [vmem:[#allocation2 + $0xb8] sm:$0xff]  ;;  %v177_v43 = vld [vmem:[#allocation2 + $0xa0] sm:$0xff]  ;;  %v179_v44 = vld [vmem:[#allocation2 + $0xb0] sm:$0xff] }
  0x2a   : > { %234 = vmatpush1.msra.mxu0 %v193_v27  ;;  %305 = vmatpush1.msra.mxu1 %v195_v28  ;;  %v174_v45 = vld [vmem:[#allocation2 + $0x88] sm:$0xff]  ;;  %v176_v46 = vld [vmem:[#allocation2 + $0x98] sm:$0xff]  ;;  %v173_v47 = vld [vmem:[#allocation2 + $0x80] sm:$0xff] }
  0x2b   : > { %235 = vmatprep.subr.mxu0 %v190_v29  ;;  %306 = vmatprep.subr.mxu1 %v192_v30  ;;  %v175_v48 = vld [vmem:[#allocation2 + $0x90] sm:$0xff]  ;;  %v170_v49 = vld [vmem:[#allocation2 + $0x68] sm:$0xff]  ;;  %v172_v50 = vld [vmem:[#allocation2 + $0x78] sm:$0xff] }
  0x2c   : > { %236 = vmatpush1.msra.mxu0 %v189_v31  ;;  %307 = vmatpush1.msra.mxu1 %v191_v32  ;;  %v169_v51 = vld [vmem:[#allocation2 + $0x60] sm:$0xff]  ;;  %v171_v52 = vld [vmem:[#allocation2 + $0x70] sm:$0xff]  ;;  %v166_v53 = vld [vmem:[#allocation2 + $0x48] sm:$0xff] }
  0x2d   : > { %237 = vmatprep.subr.mxu0 %v186_v33  ;;  %308 = vmatprep.subr.mxu1 %v188_v34  ;;  %v168_v54 = vld [vmem:[#allocation2 + $0x58] sm:$0xff]  ;;  %v165_v55 = vld [vmem:[#allocation2 + $0x40] sm:$0xff]  ;;  %v167_v56 = vld [vmem:[#allocation2 + $0x50] sm:$0xff] }
  0x2e   : > { %238 = vmatpush1.msra.mxu0 %v185_v35  ;;  %309 = vmatpush1.msra.mxu1 %v187_v36  ;;  %v162_v57 = vld [vmem:[#allocation2 + $0x28] sm:$0xff]  ;;  %v164_v58 = vld [vmem:[#allocation2 + $0x38] sm:$0xff]  ;;  %v161_v59 = vld [vmem:[#allocation2 + $0x20] sm:$0xff] }
  0x2f   : > { %239 = vmatprep.subr.mxu0 %v182_v37  ;;  %310 = vmatprep.subr.mxu1 %v184_v38  ;;  %v163_v60 = vld [vmem:[#allocation2 + $0x30] sm:$0xff]  ;;  %v158_v61 = vld [vmem:[#allocation2 + $0x8] sm:$0xff]  ;;  %v160_v62 = vld [vmem:[#allocation2 + $0x18] sm:$0xff] }
  0x30   : > { %240 = vmatpush1.msra.mxu0 %v181_v39  ;;  %311 = vmatpush1.msra.mxu1 %v183_v40  ;;  %v157_v63 = vld [vmem:[#allocation2] sm:$0xff]  ;;  %v159_v0 = vld [vmem:[#allocation2 + $0x10] sm:$0xff] }
  0x31   : > { %241 = vmatprep.subr.mxu0 %v178_v41  ;;  %312 = vmatprep.subr.mxu1 %v180_v42  ;;  %v156_v1 = vld [vmem:[%s150_s22] sm:$0xff] }
  0x32   : > { %242 = vmatpush1.msra.mxu0 %v177_v43  ;;  %313 = vmatpush1.msra.mxu1 %v179_v44 }
  0x33   : > { %243 = vmatprep.subr.mxu0 %v174_v45  ;;  %314 = vmatprep.subr.mxu1 %v176_v46 }
  0x34   : > { %244 = vmatpush1.msra.mxu0 %v173_v47  ;;  %315 = vmatpush1.msra.mxu1 %v175_v48 }
  0x35   : > { %245 = vmatprep.subr.mxu0 %v170_v49  ;;  %316 = vmatprep.subr.mxu1 %v172_v50 }
  0x36   : > { %246 = vmatpush1.msra.mxu0 %v169_v51  ;;  %317 = vmatpush1.msra.mxu1 %v171_v52 }
  0x37   : > { %247 = vmatprep.subr.mxu0 %v166_v53  ;;  %318 = vmatprep.subr.mxu1 %v168_v54 }
  0x38   : > { %248 = vmatpush1.msra.mxu0 %v165_v55  ;;  %319 = vmatpush1.msra.mxu1 %v167_v56 }
  0x39   : > { %249 = vmatprep.subr.mxu0 %v162_v57  ;;  %320 = vmatprep.subr.mxu1 %v164_v58 }
  0x3a   : > { %250 = vmatpush1.msra.mxu0 %v161_v59  ;;  %321 = vmatpush1.msra.mxu1 %v163_v60 }
  0x3b   : > { %251 = vmatprep.subr.mxu0 %v158_v61  ;;  %322 = vmatprep.subr.mxu1 %v160_v62 }
  0x3c   : > { %252 = vmatpush1.msra.mxu0 %v157_v63  ;;  %323 = vmatpush1.msra.mxu1 %v159_v0 }
  0x3d   : > { %286 = vmatmul.mubr.f32.vlgmr.msra.gmra.mxu0 %v156_v1  ;;  %357 = vmatmul.mubr.f32.vlgmr.msra.gmra.mxu1 %v156_v1 }
  0xfd   : > { %v287_v2 = vpop.f32.mrf.mxu0  ;;  %v358_v3 = vpop.f32.mrf.mxu1 }
  0xfe   : > { %363 = vst [vmem:[%s155_s26] sm:$0xff] %v287_v2  ;;  %365 = vst [vmem:[%s155_s26 + $0x10] sm:$0xff] %v358_v3 }
  0xff   : > { %v289_v4 = vpop.f32.mrf.mxu0  ;;  %v360_v5 = vpop.f32.mrf.mxu1 }
 0x100   : > { %364 = vst [vmem:[%s155_s26 + $0x8] sm:$0xff] %v289_v4  ;;  %366 = vst [vmem:[%s155_s26 + $0x18] sm:$0xff] %v360_v5 }
 0x101 PF: > { %s13_s9 = sadd.s32 1, %s505_s9  }
 0x102   : > { %p10_p1 = scmp.ge.s32.totalorder %s13_s9, 4  }
 0x104   :  { %12 = sbr.rel (!%p10_p1) target bundleno = 1 (0x1), region = 63 }
 0x109   :  { %388 = vsyncpa [#allocation3], 1 }
 0x10a   :  { %390 = vsyncpa [#allocation3 + $0x1], 1 }

</bundles_post_ra>
